<compile_context>
chip_gen: v7x
topology: tpu7x:2x2x1
jax: 0.10.0
libtpu: 0.0.40
codegen_flags: <defaults>
</compile_context>

<pallas_src>
import jax
import jax.numpy as jnp
from jax.experimental import pallas as pl
from jax.experimental.pallas import tpu as pltpu


def penguin_kernel(x_ref, w1_ref, b1_ref, w2_ref, b2_ref, w3_ref, b3_ref, o_ref):
    cdt = w1_ref.dtype                       # MXU input dtype (f32 or bf16)
    xt = x_ref[...].astype(cdt)              # (F, TB), batch on lanes

    # --- fc1 + ReLU : (10, F) @ (F, TB) -> (10, TB), f32 accumulate ---------
    h1 = jnp.dot(w1_ref[...], xt, preferred_element_type=jnp.float32)
    h1 = jnp.maximum(h1 + b1_ref[...].astype(jnp.float32), 0.0)

    # --- fc2 + ReLU : (8, 10) @ (10, TB) -> (8, TB) --------------------------
    h2 = jnp.dot(w2_ref[...], h1.astype(cdt), preferred_element_type=jnp.float32)
    h2 = jnp.maximum(h2 + b2_ref[...].astype(jnp.float32), 0.0)

    # --- fc3 : (3, 8) @ (8, TB) -> (3, TB) -----------------------------------
    h3 = jnp.dot(w3_ref[...], h2.astype(cdt), preferred_element_type=jnp.float32)
    h3 = h3 + b3_ref[...].astype(jnp.float32)

    # --- softmax over the 3 classes (sublane axis 0); lanes independent ------
    m = jnp.max(h3, axis=0, keepdims=True)
    e = jnp.exp(h3 - m)
    s = jnp.sum(e, axis=0, keepdims=True)
    o_ref[...] = (e * pl.reciprocal(s, approx=False)).astype(o_ref.dtype)


def penguin_forward_t(x_t, params, *, block_batch=32768, out_dtype=jnp.float32,
                      core_parallel=False):
    """Fast path.  x_t: (F, B) features-major input -> (3, B) probabilities.

    params: torch.nn.Linear layout -- w1 (10,F), b1 (10,1), w2 (8,10),
            b2 (8,1), w3 (3,8), b3 (3,1).  Pass bf16 weights for the bf16
            MXU path (elementwise math stays f32).
    """
    F, B = x_t.shape
    w1, b1 = params["w1"], params["b1"]
    w2, b2 = params["w2"], params["b2"]
    w3, b3 = params["w3"], params["b3"]

    # Batch tile: one big step if the whole batch fits, else lane-aligned
    # tiles; no wrapper padding -- Pallas masks the ragged last block.
    if B <= block_batch:
        tb = B
    else:
        tb = max(128, (block_batch // 128) * 128)
    grid = (pl.cdiv(B, tb),)

    batch_tile = lambda i: (0, i)     # x^T / out^T: new batch slab per step
    resident = lambda i: (0, 0)       # weights/biases stay VMEM-resident

    in_specs = [
        pl.BlockSpec((F, tb), batch_tile),
        pl.BlockSpec(w1.shape, resident),
        pl.BlockSpec(b1.shape, resident),
        pl.BlockSpec(w2.shape, resident),
        pl.BlockSpec(b2.shape, resident),
        pl.BlockSpec(w3.shape, resident),
        pl.BlockSpec(b3.shape, resident),
    ]
    out_specs = pl.BlockSpec((3, tb), batch_tile)

    sem = pltpu.CORE_PARALLEL if core_parallel else pltpu.PARALLEL

    return pl.pallas_call(
        penguin_kernel,
        out_shape=jax.ShapeDtypeStruct((3, B), out_dtype),
        grid=grid,
        in_specs=in_specs,
        out_specs=out_specs,
        compiler_params=pltpu.CompilerParams(
            dimension_semantics=(sem,),
            vmem_limit_bytes=32 * 1024 * 1024),
    )(x_t, w1, b1, w2, b2, w3, b3)


def penguin_forward(x, params, **kw):
    """Drop-in (B, F) -> (B, 3) to match the PyTorch module.

    The transposes here are wrapper-side layout plumbing; perf-sensitive
    callers should keep features-major data and call penguin_forward_t.
    """
    return penguin_forward_t(x.T, params, **kw).T


def penguin_forward_ref(x, params):
    """Pure-JAX reference (matches the PyTorch module)."""
    p = {k: v.astype(jnp.float32) for k, v in params.items()}
    h1 = jnp.maximum(x @ p["w1"].T + p["b1"].T, 0.0)
    h2 = jnp.maximum(h1 @ p["w2"].T + p["b2"].T, 0.0)
    h3 = h2 @ p["w3"].T + p["b3"].T
    return jax.nn.softmax(h3, axis=1)


def init_params(key, input_shape, dtype=jnp.float32):
    """Deterministic init, torch.nn.Linear layout: w (out, in), b (out, 1)."""
    ks = jax.random.split(key, 6)

    def u(k, shape, fan_in):
        bound = 1.0 / jnp.sqrt(fan_in)
        return jax.random.uniform(k, shape, jnp.float32, -bound, bound).astype(dtype)

    return {
        "w1": u(ks[0], (10, input_shape), input_shape),
        "b1": u(ks[1], (10, 1), input_shape),
        "w2": u(ks[2], (8, 10), 10),
        "b2": u(ks[3], (8, 1), 10),
        "w3": u(ks[4], (3, 8), 8),
        "b3": u(ks[5], (3, 1), 8),
    }


if __name__ == "__main__":
    key = jax.random.PRNGKey(0)
    k_x, k_p, k_big = jax.random.split(key, 3)

    INPUT_SHAPE = 4   # penguin features: bill len/depth, flipper len, mass
    params = init_params(k_p, INPUT_SHAPE)

    # --- small batch: single grid step, f32 weights, tight tolerance --------
    B = 8
    x = jax.random.normal(k_x, (B, INPUT_SHAPE), dtype=jnp.float32)
    out = jax.block_until_ready(penguin_forward(x, params))
    ref = penguin_forward_ref(x, params)
    assert out.shape == (B, 3)
    assert jnp.allclose(jnp.sum(out, axis=1), 1.0, atol=1e-4)
    assert jnp.allclose(out, ref, atol=1e-4, rtol=1e-4)

    # --- larger batch: batch tiling + ragged last block + bf16 weights ------
    B2 = 1000
    x2 = jax.random.normal(k_big, (B2, INPUT_SHAPE), dtype=jnp.float32)
    params_bf16 = {k: v.astype(jnp.bfloat16) for k, v in params.items()}
    out2_t = jax.block_until_ready(
        penguin_forward_t(x2.T, params_bf16, block_batch=512))   # grid = (2,), ragged tail
    ref2 = penguin_forward_ref(x2, params)
    assert out2_t.shape == (3, B2)
    assert jnp.allclose(jnp.sum(out2_t, axis=0), 1.0, atol=1e-4)
    assert jnp.allclose(out2_t.T, ref2, atol=2e-2, rtol=2e-2)    # bf16 weights

    print("KERNEL_OK")
</pallas_src>

<mosaic_0001>
module attributes {stable_mosaic.version = 11 : i64} {
  func.func @penguin_kernel(%arg0: i32, %arg1: memref<4x8xf32, #tpu.memory_space<vmem>>, %arg2: memref<10x4xf32, #tpu.memory_space<vmem>>, %arg3: memref<10x1xf32, #tpu.memory_space<vmem>>, %arg4: memref<8x10xf32, #tpu.memory_space<vmem>>, %arg5: memref<8x1xf32, #tpu.memory_space<vmem>>, %arg6: memref<3x8xf32, #tpu.memory_space<vmem>>, %arg7: memref<3x1xf32, #tpu.memory_space<vmem>>, %arg8: memref<3x8xf32, #tpu.memory_space<vmem>>) attributes {dimension_semantics = [#tpu.dimension_semantics<parallel>], iteration_bounds = array<i64: 1>, scalar_prefetch = 0 : i64, scratch_operands = 0 : i64, tpu.core_type = #tpu.core_type<tc>, window_params = [{transform_indices = @transform_0, window_bounds = array<i64: 4, 8>}, {pipeline_mode = #tpu.pipeline_mode<synchronous>, transform_indices = @transform_1, window_bounds = array<i64: 10, 4>}, {pipeline_mode = #tpu.pipeline_mode<synchronous>, transform_indices = @transform_2, window_bounds = array<i64: 10, 1>}, {pipeline_mode = #tpu.pipeline_mode<synchronous>, transform_indices = @transform_3, window_bounds = array<i64: 8, 10>}, {pipeline_mode = #tpu.pipeline_mode<synchronous>, transform_indices = @transform_4, window_bounds = array<i64: 8, 1>}, {pipeline_mode = #tpu.pipeline_mode<synchronous>, transform_indices = @transform_5, window_bounds = array<i64: 3, 8>}, {pipeline_mode = #tpu.pipeline_mode<synchronous>, transform_indices = @transform_6, window_bounds = array<i64: 3, 1>}, {transform_indices = @transform_7, window_bounds = array<i64: 3, 8>}]} {
    %c0 = arith.constant 0 : index
    %c0_0 = arith.constant 0 : index
    %0 = vector.load %arg1[%c0, %c0_0] : memref<4x8xf32, #tpu.memory_space<vmem>>, vector<4x8xf32>
    %c0_1 = arith.constant 0 : index
    %c0_2 = arith.constant 0 : index
    %1 = vector.load %arg2[%c0_1, %c0_2] : memref<10x4xf32, #tpu.memory_space<vmem>>, vector<10x4xf32>
    %cst = arith.constant dense<0.000000e+00> : vector<10x8xf32>
    %2 = tpu.matmul %1, %0, %cst {dimension_numbers = #tpu.dot_dimension_numbers<[1], [0], [0], [1], [0, 0, 1, 1], [], []>} : vector<10x4xf32>, vector<4x8xf32>, vector<10x8xf32> -> vector<10x8xf32>
    %c0_3 = arith.constant 0 : index
    %c0_4 = arith.constant 0 : index
    %3 = vector.load %arg3[%c0_3, %c0_4] : memref<10x1xf32, #tpu.memory_space<vmem>>, vector<10x1xf32>
    %4 = vector.broadcast %3 : vector<10x1xf32> to vector<10x8xf32>
    %5 = arith.addf %2, %4 : vector<10x8xf32>
    %cst_5 = arith.constant 0.000000e+00 : f32
    %6 = vector.broadcast %cst_5 : f32 to vector<10x8xf32>
    %7 = arith.maximumf %5, %6 : vector<10x8xf32>
    %c0_6 = arith.constant 0 : index
    %c0_7 = arith.constant 0 : index
    %8 = vector.load %arg4[%c0_6, %c0_7] : memref<8x10xf32, #tpu.memory_space<vmem>>, vector<8x10xf32>
    %cst_8 = arith.constant dense<0.000000e+00> : vector<8x8xf32>
    %9 = tpu.matmul %8, %7, %cst_8 {dimension_numbers = #tpu.dot_dimension_numbers<[1], [0], [0], [1], [0, 0, 1, 1], [], []>} : vector<8x10xf32>, vector<10x8xf32>, vector<8x8xf32> -> vector<8x8xf32>
    %c0_9 = arith.constant 0 : index
    %c0_10 = arith.constant 0 : index
    %10 = vector.load %arg5[%c0_9, %c0_10] : memref<8x1xf32, #tpu.memory_space<vmem>>, vector<8x1xf32>
    %11 = vector.broadcast %10 : vector<8x1xf32> to vector<8x8xf32>
    %12 = arith.addf %9, %11 : vector<8x8xf32>
    %cst_11 = arith.constant 0.000000e+00 : f32
    %13 = vector.broadcast %cst_11 : f32 to vector<8x8xf32>
    %14 = arith.maximumf %12, %13 : vector<8x8xf32>
    %c0_12 = arith.constant 0 : index
    %c0_13 = arith.constant 0 : index
    %15 = vector.load %arg6[%c0_12, %c0_13] : memref<3x8xf32, #tpu.memory_space<vmem>>, vector<3x8xf32>
    %cst_14 = arith.constant dense<0.000000e+00> : vector<3x8xf32>
    %16 = tpu.matmul %15, %14, %cst_14 {dimension_numbers = #tpu.dot_dimension_numbers<[1], [0], [0], [1], [0, 0, 1, 1], [], []>} : vector<3x8xf32>, vector<8x8xf32>, vector<3x8xf32> -> vector<3x8xf32>
    %c0_15 = arith.constant 0 : index
    %c0_16 = arith.constant 0 : index
    %17 = vector.load %arg7[%c0_15, %c0_16] : memref<3x1xf32, #tpu.memory_space<vmem>>, vector<3x1xf32>
    %18 = vector.broadcast %17 : vector<3x1xf32> to vector<3x8xf32>
    %19 = arith.addf %16, %18 : vector<3x8xf32>
    %cst_17 = arith.constant dense<0xFF800000> : vector<8xf32>
    %20 = vector.multi_reduction <maximumf>, %19, %cst_17 [0] : vector<3x8xf32> to vector<8xf32>
    %21 = vector.shape_cast %20 : vector<8xf32> to vector<1x8xf32>
    %22 = vector.broadcast %21 : vector<1x8xf32> to vector<3x8xf32>
    %23 = arith.subf %19, %22 : vector<3x8xf32>
    %24 = math.exp %23 : vector<3x8xf32>
    %cst_18 = arith.constant dense<0.000000e+00> : vector<8xf32>
    %25 = vector.multi_reduction <add>, %24, %cst_18 [0] : vector<3x8xf32> to vector<8xf32>
    %26 = vector.shape_cast %25 : vector<8xf32> to vector<1x8xf32>
    %27 = tpu.reciprocal %26 : vector<1x8xf32> -> vector<1x8xf32>
    %28 = vector.broadcast %27 : vector<1x8xf32> to vector<3x8xf32>
    %29 = arith.mulf %24, %28 : vector<3x8xf32>
    %c0_19 = arith.constant 0 : index
    %c0_20 = arith.constant 0 : index
    %30 = vector.load %arg8[%c0_19, %c0_20] : memref<3x8xf32, #tpu.memory_space<vmem>>, vector<3x8xf32>
    tpu.vector_store %arg8[%c0_19, %c0_20], %29 {strides = array<i32>} : memref<3x8xf32, #tpu.memory_space<vmem>>, vector<3x8xf32>,
    return
  }
  func.func @transform_0(%arg0: i32) -> (i32, i32) {
    %c0_i32 = arith.constant 0 : i32
    %c0_i32_0 = arith.constant 0 : i32
    return %c0_i32, %arg0 : i32, i32
  }
  func.func @transform_1(%arg0: i32) -> (i32, i32) {
    %c0_i32 = arith.constant 0 : i32
    %c0_i32_0 = arith.constant 0 : i32
    %c0_i32_1 = arith.constant 0 : i32
    return %c0_i32, %c0_i32_0 : i32, i32
  }
  func.func @transform_2(%arg0: i32) -> (i32, i32) {
    %c0_i32 = arith.constant 0 : i32
    %c0_i32_0 = arith.constant 0 : i32
    %c0_i32_1 = arith.constant 0 : i32
    return %c0_i32, %c0_i32_0 : i32, i32
  }
  func.func @transform_3(%arg0: i32) -> (i32, i32) {
    %c0_i32 = arith.constant 0 : i32
    %c0_i32_0 = arith.constant 0 : i32
    %c0_i32_1 = arith.constant 0 : i32
    return %c0_i32, %c0_i32_0 : i32, i32
  }
  func.func @transform_4(%arg0: i32) -> (i32, i32) {
    %c0_i32 = arith.constant 0 : i32
    %c0_i32_0 = arith.constant 0 : i32
    %c0_i32_1 = arith.constant 0 : i32
    return %c0_i32, %c0_i32_0 : i32, i32
  }
  func.func @transform_5(%arg0: i32) -> (i32, i32) {
    %c0_i32 = arith.constant 0 : i32
    %c0_i32_0 = arith.constant 0 : i32
    %c0_i32_1 = arith.constant 0 : i32
    return %c0_i32, %c0_i32_0 : i32, i32
  }
  func.func @transform_6(%arg0: i32) -> (i32, i32) {
    %c0_i32 = arith.constant 0 : i32
    %c0_i32_0 = arith.constant 0 : i32
    %c0_i32_1 = arith.constant 0 : i32
    return %c0_i32, %c0_i32_0 : i32, i32
  }
  func.func @transform_7(%arg0: i32) -> (i32, i32) {
    %c0_i32 = arith.constant 0 : i32
    %c0_i32_0 = arith.constant 0 : i32
    return %c0_i32, %arg0 : i32, i32
  }
}

</mosaic_0001>

<bundles_post_ra>
// kernel: tpu_custom_call.1
= control target key start
LH: loop header
LB: loop body
LE: loop exit
PB: predicated region body
PF: predicated region fallthrough
CT: control target
= control target key end

     0   :  { %vm49_vm0 = vcmask 1043456   ;;  %vm42_vm1 = vcmask 31744   ;;  %v403_v4 = vmov 0   ;;  %s491_s0 = inlined_call_operand.vmem [shape: f32[4,8], index: 0, kind: input, shape index: {}]   ;;  %s492_s1 = inlined_call_operand.vmem [shape: f32[10,4], index: 1, kind: input, shape index: {}]   ;;  %s493_s2 = inlined_call_operand.vmem [shape: f32[10,1], index: 2, kind: input, shape index: {}]   ;;  %s494_s3 = inlined_call_operand.vmem [shape: f32[8,10], index: 3, kind: input, shape index: {}]   ;;  %s495_s4 = inlined_call_operand.vmem [shape: f32[8,1], index: 4, kind: input, shape index: {}]   ;;  %s496_s5 = inlined_call_operand.vmem [shape: f32[3,8], index: 5, kind: input, shape index: {}]   ;;  %s497_s6 = inlined_call_operand.vmem [shape: f32[3,1], index: 6, kind: input, shape index: {}]   ;;  %s498_s7 = inlined_call_operand.hbm [shape: f32[3,8], index: 7, kind: output, shape index: {}]  }
   0x1   :  { %v27_v0 = vld [vmem:[%s491_s0] sm:$0xf]  ;;  %v29_v2 = vld [vmem:[%s492_s1 + $0x8] sm:$0x3]  ;;  %373 = vset.pattern.permute.xlu0 %v403_v4 }
   0x2   :  { %v28_v1 = vld [vmem:[%s492_s1] sm:$0xff]  ;;  %346 = vmatprep.subr.msk.mxu0 %vm49_vm0, %v27_v0 }
   0x3   :  { %348 = vmatprep.mubr.msk.f32.mxu0 %vm42_vm1, %v28_v1  ;;  %v30_v3 = vld [vmem:[%s493_s2] sm:$0xff]  ;;  %347 = vmatpush3.msk.msra.mxu0 %vm49_vm0, %v27_v0 }
   0x4   :  { %12 = vsyncpa [#allocation3], 0  ;;  %349 = vmatmul.mubr.msk.f32.vlgmr.msra.gmra.mrb[0].mxu0 %vm42_vm1, %v29_v2  ;;  %34 = vperm.xlu0 %373, %v30_v3   ;;  %v31_v5 = vld [vmem:[%s493_s2 + $0x8] sm:$0x3]  ;;  %v404_v6 = vmov 0.0|0.0   ;;  %vm405_vm2 = vmmov 0  }
   0x5   :  { %374 = vset.pattern.permute.xlu1 %v403_v4  ;;  %363 = vmatprep.subr.bf16.mxu1 %v404_v6  ;;  %v406_v7 = vmov 0.0   ;;  %v131_v8 = vld [vmem:[%s495_s4] sm:$0xff]  ;;  %vm141_vm3 = vcmask 1041408   ;;  %vm407_vm4 = vmmov 1   ;;  %vm137_vm6 = vcmask 80896  }
   0x6   :  { %355 = vmatprep.mubr.msk.f32.mxu1 %vm405_vm2, %v406_v7  ;;  %358 = vmatprep.subr.mxu0 %v406_v7  ;;  %v217_v9 = vld [vmem:[%s497_s6] sm:$0x7]  ;;  %vm365_vm5 = vmpackc.low %vm141_vm3, %vm407_vm4  ;;  %vm223_vm7 = vcmask 64512   ;;  %vm297_vm8 = vcmask 59392  }
   0x7   :  { %360 = vmatprep.mubr.msk.f32.mxu0 %vm405_vm2, %v406_v7  ;;  %134 = vperm.xlu1 %374, %v131_v8   ;;  %v130_v19 = vld [vmem:[%s494_s3] sm:$0xff]  ;;  %s408_s3 = smov [#allocation2]  }
   0x8   :  { %39 = vperm.xlu0 %373, %v31_v5   ;;  %v216_v25 = vld [vmem:[%s496_s5] sm:$0x7]  ;;  %s324_s5 = sshll.u32 %s408_s3, 4  ;;  %s325_s5 = int_to_ptr.vmem [resolvable:$true] %s324_s5 }
   0x9   :  { %s379_s14 = scalar_lea.vmem %s325_s5, 64  ;;  %p384_p1 = scmp.lt.s32.totalorder %s325_s5, %s325_s5 }
   0xa   :  { %p380_p0 = scmp.ne.s32.totalorder %s325_s5, %s379_s14  ;;  %p385_p2 = scmp.lt.s32.totalorder %s379_s14, %s379_s14 }
   0xb   :  { %220 = vperm.xlu1 %374, %v217_v9  }
   0xc   :  { %p386_p3 = por %p385_p2, %p384_p1 }
   0xe   :  { %p387_p4 = pnand %p386_p3, %p380_p0 }
  0x83   :  { %v35_v10 = vpop.permute.xlu0 %34 }
  0x86   :  { %v135_v20 = vpop.permute.xlu1 %134 }
  0x87   :  { %v40_v11 = vpop.permute.xlu0 %39 }
  0x8a   :  { %v221_v26 = vpop.permute.xlu1 %220 }
  0xd7   :  { %v350_v12 = vpop.f32.mrb[0].mxu0 }
  0xd8   :  { %v125_v13 = vadd.f32 %v350_v12, %v40_v11  ;;  %v119_v14 = vpop.f32.mrb[1].mxu0 }
  0xd9   :  { %v120_v15 = vadd.f32 %v119_v14, %v35_v10 }
  0xda   :  { %v129_v16 = vmax.f32 %v125_v13, 0.0 }
  0xdb   :  { %v128_v17 = vmax.f32 %v120_v15, 0.0 }
  0xdd   :  { %v364_v18 = vpack.c.bf16 %v129_v16, %v128_v17 }
  0xdf   :  { %366 = vmatpush3.bf16.msk.msra.mxu1 %vm365_vm5, %v364_v18 }
  0xe2   :  { %356 = vmatmul.mubr.msk.f32.vlgmr.msra.gmra.mrb[0].mxu1 %vm137_vm6, %v130_v19 }
 0x1b5   :  { %v211_v21 = vpop.f32.mrb[0].mxu1 }
 0x1b6   :  { %v212_v22 = vadd.f32 %v211_v21, %v135_v20  ;;  %v357_v23 = vpop.f32.mrb[1].mxu1 }
 0x1b8   :  { %v215_v24 = vmax.f32 %v212_v22, 0.0 }
 0x1ba   :  { %359 = vmatpush3.msra.mxu0 %v215_v24 }
 0x1bb   :  { %361 = vmatmul.mubr.msk.f32.vlgmr.msra.gmra.mrb[2].mxu0 %vm223_vm7, %v216_v25 }
 0x28e   :  { %v293_v27 = vpop.f32.mrb[2].mxu0 }
 0x28f   :  { %v294_v28 = vadd.f32 %v293_v27, %v221_v26  ;;  %v362_v29 = vpop.f32.mrb[3].mxu0 }
 0x291   :  { %v298_v30 = vsel %vm297_vm8, %v294_v28, -inf }
 0x292   :  { %v299_v31 = vrot.slane %v298_v30, 4 }
 0x294   :  { %v300_v32 = vmax.f32 %v298_v30, %v299_v31 }
 0x296   :  { %v301_v33 = vrot.slane %v300_v32, 2 }
 0x298   :  { %v302_v34 = vmax.f32 %v300_v32, %v301_v33 }
 0x29a   :  { %v303_v35 = vrot.slane %v302_v34, 1 }
 0x29c   :  { %v304_v36 = vmax.f32 %v302_v34, %v303_v35 }
 0x29e   :  { %v305_v37 = vsub.f32 %v294_v28, %v304_v36 }
 0x2a0   :  { %v306_v38 = vmul.f32 1.442695, %v305_v37 }
 0x2a2   :  { %375 = vpow2.f32 %v306_v38 }
 0x2ac   :  { %v376_v39 = vpop.eup %375 }
 0x2ad   :  { %v308_v40 = vsel %vm297_vm8, %v376_v39, 0.0 }
 0x2ae   :  { %v309_v41 = vrot.slane %v308_v40, 4 }
 0x2b0   :  { %v310_v42 = vadd.f32 %v309_v41, %v308_v40 }
 0x2b2   :  { %v311_v43 = vrot.slane %v310_v42, 2 }
 0x2b4   :  { %v312_v44 = vadd.f32 %v311_v43, %v310_v42 }
 0x2b6   :  { %v313_v45 = vrot.slane %v312_v44, 1 }
 0x2b8   :  { %v314_v46 = vadd.f32 %v313_v45, %v312_v44 }
 0x2ba   :  { %377 = vrcp.f32 %v314_v46 }
 0x2c4   :  { %v378_v47 = vpop.eup %377 }
 0x2c5   :  { %v316_v48 = vmul.f32 %v378_v47, %v376_v39 }
 0x2c7   :  { %317 = vst.msk [vmem:[#allocation2] sm:$0x7] %vm297_vm8, %v316_v48 }
 0x2c8   :  { %390 = shalt.err (!%p387_p4)
}
 0x2c9   :  { %s391_s17 = scalar_lea.hbm %s498_s7, 64 }
 0x2ca   :  { %p392_p5 = scmp.ne.s32.totalorder %s498_s7, %s391_s17  ;;  %p395_p6 = scmp.lt.u32.totalorder %s391_s17, %s498_s7 }
 0x2cc   :  { %p397_p7 = pnand %p395_p6, %p392_p5 }
 0x2ce   :  { %400 = shalt.err (!%p397_p7)
}
 0x2cf   :  { %327 = dma.vmem_to_hbm [thread:$0]  %s325_s5, 64, %s498_s7, [#allocation3]  }
 0x2d0   :  { %401 = dma.done.wait [#allocation3], 64  }
 0x2d1   :  { %402 = vsyncadd [#allocation3], 4294967232 }
 0x2d2   :  { %331 = vsyncpa [#allocation3], 1 }

</bundles_post_ra>
